<compile_context>
chip_gen: v5e
topology: v5e:2x2
jax: 0.10.0
libtpu: 0.0.40
codegen_flags: <defaults>
</compile_context>

<pallas_src>
import math

import jax
import jax.numpy as jnp
from jax.experimental import pallas as pl
from jax.experimental.pallas import tpu as pltpu


def _round_up(a, b):
    return ((a + b - 1) // b) * b


def _linear_group_nj_kernel(x_ref, wmu_ref, wvar_ref, bmu_ref, bvar_ref,
                            zmu_ref, zstd_ref, eps_z_ref, eps_out_ref, o_ref):
    x = x_ref[...]                                        # (TN, IN)

    # conv1d(kernel_size=1) == matmul; both MXU matmuls reuse the same x tile.
    mu_act = jnp.dot(x, wmu_ref[...],
                     preferred_element_type=jnp.float32) + bmu_ref[...]
    var_act = jnp.dot(x * x, wvar_ref[...],
                      preferred_element_type=jnp.float32) + bvar_ref[...]

    # z = reparameterize(z_mu, z_logvar) = z_mu + eps * exp(0.5*z_logvar)
    # (exp(0.5*z_logvar) precomputed in the wrapper as z_std)
    z = zmu_ref[...] + eps_z_ref[...] * zstd_ref[...]     # (TN, TO)

    # out = reparameterize(mu_act*z, log(var_act*z^2))
    #   std = exp(0.5*log(var_act*z^2)) == sqrt(var_act) * |z|
    std = jnp.sqrt(var_act) * jnp.abs(z)
    o_ref[...] = (mu_act * z + eps_out_ref[...] * std).astype(o_ref.dtype)


def linear_group_nj_forward(x, params, eps_z, eps_out, *, tile_n=256, tile_out=256):
    """x: (N, IN) float32. eps_z/eps_out: (N, OUT) float32. Returns (N, OUT) float32."""
    N, IN = x.shape
    OUT = params["bias_mu"].shape[0]

    # ---- parameter plumbing (glue): squeeze kernel dim, transpose, hoist exps ----
    w_mu_t = jnp.transpose(params["weight_mu"][:, :, 0])              # (IN, OUT)
    w_var_t = jnp.exp(jnp.transpose(params["weight_logvar"][:, :, 0]))  # (IN, OUT)
    b_mu = params["bias_mu"].reshape(1, OUT)
    b_var = jnp.exp(params["bias_logvar"]).reshape(1, OUT)
    z_mu = params["z_mu"].reshape(1, OUT)
    z_std = jnp.exp(0.5 * params["z_logvar"]).reshape(1, OUT)

    # ---- tile sizes (MXU-friendly N tile, lane-dense OUT tile) + padding ----
    tn = min(tile_n, _round_up(N, 8))          # multiple of 8 (sublane)
    to = min(tile_out, _round_up(OUT, 128))    # multiple of 128 (lane)
    n_pad = _round_up(N, tn)
    out_pad = _round_up(OUT, to)

    def pad2(a, rows, cols):
        return jnp.pad(a, ((0, rows - a.shape[0]), (0, cols - a.shape[1])))

    x_p = pad2(x, n_pad, IN)
    w_mu_p = pad2(w_mu_t, IN, out_pad)
    w_var_p = pad2(w_var_t, IN, out_pad)
    b_mu_p = pad2(b_mu, 1, out_pad)
    b_var_p = pad2(b_var, 1, out_pad)
    z_mu_p = pad2(z_mu, 1, out_pad)
    z_std_p = pad2(z_std, 1, out_pad)
    eps_z_p = pad2(eps_z, n_pad, out_pad)
    eps_out_p = pad2(eps_out, n_pad, out_pad)

    grid = (n_pad // tn, out_pad // to)

    # NOTE: IN is kept un-tiled (full-K matmul per step); for very large IN an
    # inner "arbitrary" K axis with a VMEM accumulator could be added.
    out = pl.pallas_call(
        _linear_group_nj_kernel,
        out_shape=jax.ShapeDtypeStruct((n_pad, out_pad), jnp.float32),
        grid_spec=pltpu.PrefetchScalarGridSpec(
            num_scalar_prefetch=0,
            grid=grid,
            in_specs=[
                pl.BlockSpec((tn, IN), lambda i, j: (i, 0)),   # x
                pl.BlockSpec((IN, to), lambda i, j: (0, j)),   # W_mu^T
                pl.BlockSpec((IN, to), lambda i, j: (0, j)),   # exp(W_logvar)^T
                pl.BlockSpec((1, to), lambda i, j: (0, j)),    # b_mu
                pl.BlockSpec((1, to), lambda i, j: (0, j)),    # exp(b_logvar)
                pl.BlockSpec((1, to), lambda i, j: (0, j)),    # z_mu
                pl.BlockSpec((1, to), lambda i, j: (0, j)),    # exp(0.5*z_logvar)
                pl.BlockSpec((tn, to), lambda i, j: (i, j)),   # eps_z
                pl.BlockSpec((tn, to), lambda i, j: (i, j)),   # eps_out
            ],
            out_specs=pl.BlockSpec((tn, to), lambda i, j: (i, j)),
        ),
        compiler_params=pltpu.CompilerParams(
            dimension_semantics=("parallel", "parallel")),
    )(x_p, w_mu_p, w_var_p, b_mu_p, b_var_p, z_mu_p, z_std_p, eps_z_p, eps_out_p)

    return out[:N, :OUT]


def init_params(key, in_features, out_features):
    """Deterministic re-implementation of _ConvNdGroupNJ.reset_parameters
    (kernel_size=(1,), init_weight=None, init_bias=None)."""
    n = in_features * 1
    stdv = 1.0 / math.sqrt(n)
    k1, k2, k3, k4, k5 = jax.random.split(key, 5)
    return {
        "weight_mu": jax.random.uniform(
            k1, (out_features, in_features, 1), jnp.float32, minval=-stdv, maxval=stdv),
        "bias_mu": jnp.zeros((out_features,), jnp.float32),
        "z_mu": 1.0 + 0.01 * jax.random.normal(k2, (out_features,), jnp.float32),
        "z_logvar": -9.0 + 0.01 * jax.random.normal(k3, (out_features,), jnp.float32),
        "weight_logvar": -9.0 + 0.01 * jax.random.normal(
            k4, (out_features, in_features, 1), jnp.float32),
        "bias_logvar": -9.0 + 0.01 * jax.random.normal(k5, (out_features,), jnp.float32),
    }


def reference_forward(x, params, eps_z, eps_out):
    """Pure-JAX reference mirroring the PyTorch forward (training path)."""
    w_mu = params["weight_mu"][:, :, 0]          # (OUT, IN)
    w_lv = params["weight_logvar"][:, :, 0]      # (OUT, IN)
    mu_act = x @ w_mu.T + params["bias_mu"]
    var_act = (x * x) @ jnp.exp(w_lv).T + jnp.exp(params["bias_logvar"])
    z = params["z_mu"][None, :] + eps_z * jnp.exp(0.5 * params["z_logvar"])[None, :]
    return mu_act * z + eps_out * jnp.exp(0.5 * jnp.log(var_act * z * z))


if __name__ == "__main__":
    IN_FEATURES = 32
    OUT_FEATURES = 32
    BATCH = 8

    key = jax.random.PRNGKey(0)
    k_param, k_x, k_ez, k_eo = jax.random.split(key, 4)

    params = init_params(k_param, IN_FEATURES, OUT_FEATURES)
    x = jax.random.normal(k_x, (BATCH, IN_FEATURES), jnp.float32)
    eps_z = jax.random.normal(k_ez, (BATCH, OUT_FEATURES), jnp.float32)
    eps_out = jax.random.normal(k_eo, (BATCH, OUT_FEATURES), jnp.float32)

    out = linear_group_nj_forward(x, params, eps_z, eps_out)
    out = jax.block_until_ready(out)

    ref = reference_forward(x, params, eps_z, eps_out)
    assert out.shape == (BATCH, OUT_FEATURES)
    assert jnp.allclose(out, ref, atol=1e-4, rtol=1e-4)

    print("KERNEL_OK")
</pallas_src>

<mosaic_0001>
module attributes {stable_mosaic.version = 11 : i64} {
  func.func @_linear_group_nj_kernel(%arg0: i32, %arg1: i32, %arg2: memref<8x32xf32, #tpu.memory_space<vmem>>, %arg3: memref<32x128xf32, #tpu.memory_space<vmem>>, %arg4: memref<32x128xf32, #tpu.memory_space<vmem>>, %arg5: memref<1x128xf32, #tpu.memory_space<vmem>>, %arg6: memref<1x128xf32, #tpu.memory_space<vmem>>, %arg7: memref<1x128xf32, #tpu.memory_space<vmem>>, %arg8: memref<1x128xf32, #tpu.memory_space<vmem>>, %arg9: memref<8x128xf32, #tpu.memory_space<vmem>>, %arg10: memref<8x128xf32, #tpu.memory_space<vmem>>, %arg11: memref<8x128xf32, #tpu.memory_space<vmem>>) attributes {dimension_semantics = [#tpu.dimension_semantics<parallel>, #tpu.dimension_semantics<parallel>], iteration_bounds = array<i64: 1, 1>, scalar_prefetch = 0 : i64, scratch_operands = 0 : i64, tpu.core_type = #tpu.core_type<tc>, window_params = [{transform_indices = @transform_0, window_bounds = array<i64: 8, 32>}, {transform_indices = @transform_1, window_bounds = array<i64: 32, 128>}, {transform_indices = @transform_2, window_bounds = array<i64: 32, 128>}, {transform_indices = @transform_3, window_bounds = array<i64: 1, 128>}, {transform_indices = @transform_4, window_bounds = array<i64: 1, 128>}, {transform_indices = @transform_5, window_bounds = array<i64: 1, 128>}, {transform_indices = @transform_6, window_bounds = array<i64: 1, 128>}, {transform_indices = @transform_7, window_bounds = array<i64: 8, 128>}, {transform_indices = @transform_8, window_bounds = array<i64: 8, 128>}, {transform_indices = @transform_9, window_bounds = array<i64: 8, 128>}]} {
    %c0 = arith.constant 0 : index
    %c0_0 = arith.constant 0 : index
    %0 = vector.load %arg2[%c0, %c0_0] : memref<8x32xf32, #tpu.memory_space<vmem>>, vector<8x32xf32>
    %c0_1 = arith.constant 0 : index
    %c0_2 = arith.constant 0 : index
    %1 = vector.load %arg3[%c0_1, %c0_2] : memref<32x128xf32, #tpu.memory_space<vmem>>, vector<32x128xf32>
    %cst = arith.constant dense<0.000000e+00> : vector<8x128xf32>
    %2 = tpu.matmul %0, %1, %cst {dimension_numbers = #tpu.dot_dimension_numbers<[1], [0], [0], [1], [0, 0, 1, 1], [], []>} : vector<8x32xf32>, vector<32x128xf32>, vector<8x128xf32> -> vector<8x128xf32>
    %c0_3 = arith.constant 0 : index
    %c0_4 = arith.constant 0 : index
    %3 = vector.load %arg5[%c0_3, %c0_4] : memref<1x128xf32, #tpu.memory_space<vmem>>, vector<1x128xf32>
    %4 = vector.broadcast %3 : vector<1x128xf32> to vector<8x128xf32>
    %5 = arith.addf %2, %4 : vector<8x128xf32>
    %6 = arith.mulf %0, %0 : vector<8x32xf32>
    %c0_5 = arith.constant 0 : index
    %c0_6 = arith.constant 0 : index
    %7 = vector.load %arg4[%c0_5, %c0_6] : memref<32x128xf32, #tpu.memory_space<vmem>>, vector<32x128xf32>
    %cst_7 = arith.constant dense<0.000000e+00> : vector<8x128xf32>
    %8 = tpu.matmul %6, %7, %cst_7 {dimension_numbers = #tpu.dot_dimension_numbers<[1], [0], [0], [1], [0, 0, 1, 1], [], []>} : vector<8x32xf32>, vector<32x128xf32>, vector<8x128xf32> -> vector<8x128xf32>
    %c0_8 = arith.constant 0 : index
    %c0_9 = arith.constant 0 : index
    %9 = vector.load %arg6[%c0_8, %c0_9] : memref<1x128xf32, #tpu.memory_space<vmem>>, vector<1x128xf32>
    %10 = vector.broadcast %9 : vector<1x128xf32> to vector<8x128xf32>
    %11 = arith.addf %8, %10 : vector<8x128xf32>
    %c0_10 = arith.constant 0 : index
    %c0_11 = arith.constant 0 : index
    %12 = vector.load %arg7[%c0_10, %c0_11] : memref<1x128xf32, #tpu.memory_space<vmem>>, vector<1x128xf32>
    %c0_12 = arith.constant 0 : index
    %c0_13 = arith.constant 0 : index
    %13 = vector.load %arg9[%c0_12, %c0_13] : memref<8x128xf32, #tpu.memory_space<vmem>>, vector<8x128xf32>
    %c0_14 = arith.constant 0 : index
    %c0_15 = arith.constant 0 : index
    %14 = vector.load %arg8[%c0_14, %c0_15] : memref<1x128xf32, #tpu.memory_space<vmem>>, vector<1x128xf32>
    %15 = vector.broadcast %14 : vector<1x128xf32> to vector<8x128xf32>
    %16 = arith.mulf %13, %15 : vector<8x128xf32>
    %17 = vector.broadcast %12 : vector<1x128xf32> to vector<8x128xf32>
    %18 = arith.addf %17, %16 : vector<8x128xf32>
    %19 = math.sqrt %11 : vector<8x128xf32>
    %20 = math.absf %18 : vector<8x128xf32>
    %21 = arith.mulf %19, %20 : vector<8x128xf32>
    %22 = arith.mulf %5, %18 : vector<8x128xf32>
    %c0_16 = arith.constant 0 : index
    %c0_17 = arith.constant 0 : index
    %23 = vector.load %arg10[%c0_16, %c0_17] : memref<8x128xf32, #tpu.memory_space<vmem>>, vector<8x128xf32>
    %24 = arith.mulf %23, %21 : vector<8x128xf32>
    %25 = arith.addf %22, %24 : vector<8x128xf32>
    %c0_18 = arith.constant 0 : index
    %c0_19 = arith.constant 0 : index
    %26 = vector.load %arg11[%c0_18, %c0_19] : memref<8x128xf32, #tpu.memory_space<vmem>>, vector<8x128xf32>
    tpu.vector_store %arg11[%c0_18, %c0_19], %25 {strides = array<i32>} : memref<8x128xf32, #tpu.memory_space<vmem>>, vector<8x128xf32>,
    return
  }
  func.func @transform_0(%arg0: i32, %arg1: i32) -> (i32, i32) {
    %c0_i32 = arith.constant 0 : i32
    %c0_i32_0 = arith.constant 0 : i32
    return %arg0, %c0_i32 : i32, i32
  }
  func.func @transform_1(%arg0: i32, %arg1: i32) -> (i32, i32) {
    %c0_i32 = arith.constant 0 : i32
    %c0_i32_0 = arith.constant 0 : i32
    return %c0_i32, %arg1 : i32, i32
  }
  func.func @transform_2(%arg0: i32, %arg1: i32) -> (i32, i32) {
    %c0_i32 = arith.constant 0 : i32
    %c0_i32_0 = arith.constant 0 : i32
    return %c0_i32, %arg1 : i32, i32
  }
  func.func @transform_3(%arg0: i32, %arg1: i32) -> (i32, i32) {
    %c0_i32 = arith.constant 0 : i32
    %c0_i32_0 = arith.constant 0 : i32
    return %c0_i32, %arg1 : i32, i32
  }
  func.func @transform_4(%arg0: i32, %arg1: i32) -> (i32, i32) {
    %c0_i32 = arith.constant 0 : i32
    %c0_i32_0 = arith.constant 0 : i32
    return %c0_i32, %arg1 : i32, i32
  }
  func.func @transform_5(%arg0: i32, %arg1: i32) -> (i32, i32) {
    %c0_i32 = arith.constant 0 : i32
    %c0_i32_0 = arith.constant 0 : i32
    return %c0_i32, %arg1 : i32, i32
  }
  func.func @transform_6(%arg0: i32, %arg1: i32) -> (i32, i32) {
    %c0_i32 = arith.constant 0 : i32
    %c0_i32_0 = arith.constant 0 : i32
    return %c0_i32, %arg1 : i32, i32
  }
  func.func @transform_7(%arg0: i32, %arg1: i32) -> (i32, i32) {
    %c0_i32 = arith.constant 0 : i32
    return %arg0, %arg1 : i32, i32
  }
  func.func @transform_8(%arg0: i32, %arg1: i32) -> (i32, i32) {
    %c0_i32 = arith.constant 0 : i32
    return %arg0, %arg1 : i32, i32
  }
  func.func @transform_9(%arg0: i32, %arg1: i32) -> (i32, i32) {
    %c0_i32 = arith.constant 0 : i32
    return %arg0, %arg1 : i32, i32
  }
}

</mosaic_0001>

<bundles_post_ra>
// kernel: tpu_custom_call.1
= control target key start
LH: loop header
LB: loop body
LE: loop exit
PB: predicated region body
PF: predicated region fallthrough
CT: control target
= control target key end

     0   :  { %14 = vsyncpa [#allocation3], 0  ;;  %s475_s0 = inlined_call_operand.hbm [shape: f32[8,32], index: 0, kind: input, shape index: {}]   ;;  %s476_s1 = inlined_call_operand.hbm [shape: f32[32,128], index: 1, kind: input, shape index: {}]   ;;  %s477_s2 = inlined_call_operand.hbm [shape: f32[32,128], index: 2, kind: input, shape index: {}]   ;;  %s478_s3 = inlined_call_operand.vmem [shape: f32[1,128], index: 3, kind: input, shape index: {}]   ;;  %s479_s4 = inlined_call_operand.vmem [shape: f32[1,128], index: 4, kind: input, shape index: {}]   ;;  %s480_s5 = inlined_call_operand.vmem [shape: f32[1,128], index: 5, kind: input, shape index: {}]   ;;  %s481_s6 = inlined_call_operand.vmem [shape: f32[1,128], index: 6, kind: input, shape index: {}]   ;;  %s482_s7 = inlined_call_operand.hbm [shape: f32[8,128], index: 7, kind: input, shape index: {}]   ;;  %s483_s8 = inlined_call_operand.hbm [shape: f32[8,128], index: 8, kind: input, shape index: {}]   ;;  %s484_s9 = inlined_call_operand.hbm [shape: f32[8,128], index: 9, kind: output, shape index: {}]  }
   0x1   :  { %15 = vsyncpa [#allocation6], 0 }
   0x2   :  { %16 = vsyncpa [#allocation9], 0  ;;  %s33_s11 = sshll.u32 %s476_s1, 4  ;;  %s34_s11 = int_to_ptr.hbm [resolvable:$true] %s33_s11 }
   0x3   :  { %17 = vsyncpa [#allocation4], 0  ;;  %s387_s12 = smov [#allocation5]   ;;  %s68_s16 = sshll.u32 %s482_s7, 4  ;;  %s69_s16 = int_to_ptr.hbm [resolvable:$true] %s68_s16 }
   0x4   :  { %s35_s13 = sshll.u32 %s387_s12, 4  ;;  %s388_s17 = smov 128   ;;  %s36_s13 = int_to_ptr.vmem [resolvable:$true] %s35_s13 }
   0x5   :  { %s389_s18 = smov 8   ;;  %s390_s19 = smov [#allocation8]  }
   0x6   :  { %41 = dma.hbm_to_vmem [thread:$0]  %s34_s11, 512, %s36_s13, [#allocation6], %s388_s17, %s388_s17, %s389_s18  }
   0x7   :  { %s70_s20 = sshll.u32 %s390_s19, 4  ;;  %s23_s23 = sshll.u32 %s475_s0, 4  ;;  %s71_s20 = int_to_ptr.vmem [resolvable:$true] %s70_s20  ;;  %s24_s23 = int_to_ptr.hbm [resolvable:$true] %s23_s23 }
   0x8   :  { %73 = dma.hbm_to_vmem [thread:$0]  %s69_s16, 128, %s71_s20, [#allocation9]  }
   0x9   :  { %s46_s25 = sshll.u32 %s477_s2, 4  ;;  %s391_s26 = smov [#allocation2]   ;;  %s47_s25 = int_to_ptr.hbm [resolvable:$true] %s46_s25 }
   0xa   :  { %s25_s27 = sshll.u32 %s391_s26, 4  ;;  %s392_s7 = smov [#allocation7]   ;;  %s26_s27 = int_to_ptr.vmem [resolvable:$true] %s25_s27 }
   0xb   :  { %28 = dma.hbm_to_vmem [thread:$0]  %s24_s23, 128, %s26_s27, [#allocation3]  }
   0xc   :  { %s48_s28 = sshll.u32 %s392_s7, 4  ;;  %s79_s10 = sshll.u32 %s483_s8, 4  ;;  %s49_s28 = int_to_ptr.vmem [resolvable:$true] %s48_s28  ;;  %s80_s10 = int_to_ptr.hbm [resolvable:$true] %s79_s10 }
   0xd   :  { %54 = dma.hbm_to_vmem [thread:$0]  %s47_s25, 512, %s49_s28, [#allocation6], %s388_s17, %s388_s17, %s389_s18  }
   0xe   :  { %s393_s0 = smov [#allocation10]  }
   0xf   :  { %s81_s11 = sshll.u32 %s393_s0, 4  ;;  %s82_s11 = int_to_ptr.vmem [resolvable:$true] %s81_s11 }
  0x10   :  { %84 = dma.hbm_to_vmem [thread:$0]  %s80_s10, 128, %s82_s11, [#allocation9]  }
  0x11   :  { %379 = dma.done.wait [#allocation3], 128  }
  0x12   :  { %380 = vsyncadd [#allocation3], 4294967168 }
  0x13   :  { %381 = dma.done.wait [#allocation6], 1024  }
  0x14   :  { %382 = vsyncadd [#allocation6], 4294966272 }
  0x15   :  { %383 = dma.done.wait [#allocation9], 256  }
  0x16   :  { %384 = vsyncadd [#allocation9], 4294967040  ;;  %v142_v0 = vld [vmem:[#allocation7 + $0x18] sm:$0xff]  ;;  %v141_v1 = vld [vmem:[#allocation7 + $0x10] sm:$0xff]  ;;  %vm114_vm0 = vcmask 261120  }
  0x17   :  { %162 = vmatpush.msra.mxu1 %v142_v0  ;;  %v105_v2 = vld [vmem:[#allocation2] sm:$0xff]  ;;  %v140_v4 = vld [vmem:[#allocation7 + $0x8] sm:$0xff]  ;;  %v108_v5 = vld [vmem:[#allocation5 + $0x10] sm:$0xff] }
  0x18   :  { %v109_v3 = vld [vmem:[#allocation5 + $0x18] sm:$0xff]  ;;  %v107_v6 = vld [vmem:[#allocation5 + $0x8] sm:$0xff]  ;;  %v139_v7 = vld [vmem:[#allocation7] sm:$0xff]  ;;  %v138_v8 = vmul.f32 %v105_v2, %v105_v2 }
  0x19   :  { %130 = vmatpush.msra.mxu0 %v109_v3  ;;  %163 = vmatpush.msra.mxu1 %v141_v1  ;;  %v106_v9 = vld [vmem:[#allocation5] sm:$0xff]  ;;  %v229_v10 = vld [vmem:[%s479_s4] ss:$0 sm:$0xff]  ;;  %v196_v32 = vld [vmem:[#allocation10] sm:$0xff]  ;;  %s394_s4 = smov [#allocation11]  }
  0x1a   :  { %v231_v13 = vld [vmem:[%s481_s6] ss:$0 sm:$0xff]  ;;  %v171_v15 = vld [vmem:[#allocation8] sm:$0xff] }
  0x1b   :  { %131 = vmatpush.msra.mxu0 %v108_v5  ;;  %164 = vmatpush.msra.mxu1 %v140_v4  ;;  %v176_v17 = vmul.f32 %v231_v13, %v171_v15  ;;  %v232_v18 = vld [vmem:[%s480_s5] ss:$0 sm:$0xff]  ;;  %s205_s5 = sshll.u32 %s394_s4, 4  ;;  %s206_s5 = int_to_ptr.vmem [resolvable:$true] %s205_s5 }
  0x1c   :  { %v230_v21 = vld [vmem:[%s478_s3] ss:$0 sm:$0xff]  ;;  %s207_s3 = sshll.u32 %s484_s9, 4  ;;  %s208_s3 = int_to_ptr.hbm [resolvable:$true] %s207_s3 }
  0x1d   :  { %132 = vmatpush.msra.mxu0 %v107_v6  ;;  %165 = vmatpush.msra.mxu1 %v139_v7  ;;  %v180_v22 = vadd.f32 %v232_v18, %v176_v17 }
  0x1e   :  { %220 = vmatmul.msk.f32.vlgmr.msra.gmra.mxu1 %vm114_vm0, %v138_v8 }
  0x1f   :  { %133 = vmatpush.msra.mxu0 %v106_v9  ;;  %v193_v28 = vand.u32 2147483647, %v180_v22 }
  0x20   :  { %219 = vmatmul.msk.f32.vlgmr.msra.gmra.mxu0 %vm114_vm0, %v105_v2 }
  0x9b   :  { %v167_v11 = vpop.f32.mrf.mxu1 }
  0x9c   :  { %v168_v12 = vadd.f32 %v229_v10, %v167_v11 }
  0x9d   :  { %v135_v24 = vpop.f32.mrf.mxu0 }
  0x9e   :  { %233 = vrsqrt.f32 %v168_v12  ;;  %v136_v26 = vadd.f32 %v230_v21, %v135_v24  ;;  %vm188_vm1 = vcmp.eq.f32.partialorder %v168_v12, inf  ;;  %v191_v29 = vand.u32 2147483648, %v168_v12 }
  0x9f   :  { %vm190_vm2 = vcmp.eq.f32.partialorder %v168_v12, 0.0 }
  0xa0   :  { %v195_v34 = vmul.f32 %v180_v22, %v136_v26 }
  0xa4   :  { %v234_v14 = vpop.eup %233 }
  0xa5   :  { %v182_v16 = vmul.f32 %v234_v14, %v168_v12 }
  0xa7   :  { %v183_v19 = vmul.f32 %v234_v14, %v182_v16 }
  0xa9   :  { %v184_v20 = vmul.f32 0.5, %v183_v19 }
  0xab   :  { %v185_v23 = vsub.f32 1.5, %v184_v20 }
  0xad   :  { %v186_v25 = vmul.f32 %v234_v14, %v185_v23 }
  0xaf   :  { %v187_v27 = vmul.f32 %v186_v25, %v168_v12 }
  0xb1   :  { %v189_v30 = vsel %vm188_vm1, %v168_v12, %v187_v27 }
  0xb2   :  { %v192_v31 = vsel %vm190_vm2, %v191_v29, %v189_v30 }
  0xb3   :  { %v194_v33 = vmul.f32 %v193_v28, %v192_v31 }
  0xb5   :  { %v197_v35 = vmul.f32 %v196_v32, %v194_v33 }
  0xb7   :  { %v198_v36 = vadd.f32 %v197_v35, %v195_v34 }
  0xb9   :  { %199 = vst [vmem:[#allocation11] sm:$0xff] %v198_v36 }
  0xba   :  { %210 = dma.vmem_to_hbm [thread:$0]  %s206_s5, 128, %s208_s3, [#allocation4]  }
  0xbb   :  { %385 = dma.done.wait [#allocation4], 128  }
  0xbc   :  { %386 = vsyncadd [#allocation4], 4294967168 }
  0xbd   :  { %215 = vsyncpa [#allocation3], 1 }
  0xbe   :  { %216 = vsyncpa [#allocation6], 1 }
  0xbf   :  { %217 = vsyncpa [#allocation9], 1 }
  0xc0   :  { %218 = vsyncpa [#allocation4], 1 }

</bundles_post_ra>
